<compile_context>
chip_gen: v7x
topology: tpu7x:2x2x1
jax: 0.10.0
libtpu: 0.0.40
codegen_flags: <defaults>
</compile_context>

<pallas_src>
import functools
import math

import jax
import jax.numpy as jnp
from jax.experimental import pallas as pl
from jax.experimental.pallas import tpu as pltpu


def _round_up(x, m):
    return ((x + m - 1) // m) * m


def _actor_kernel(x_ref, w1_ref, b_ref, w2_ref, o_ref, *, mxu_dtype):
    H = w1_ref.shape[1]          # hidden width (128)
    d_out_p = w2_ref.shape[1]    # lane-padded output width (multiple of 128)

    # fc1 on the MXU, f32 accumulation.
    x = x_ref[...].astype(mxu_dtype)
    w1 = w1_ref[...].astype(mxu_dtype)
    h = jnp.dot(x, w1, preferred_element_type=jnp.float32)

    # f32 epilogue (bias + tanh) -- keeps the VPU/EUP path valid on v5e too.
    h = h + b_ref[0:1, :H]
    h = jnp.tanh(h)

    # fc2 on the MXU, f32 accumulation, lane-dense (padded) output.
    out = jnp.dot(h.astype(mxu_dtype), w2_ref[...].astype(mxu_dtype),
                  preferred_element_type=jnp.float32)
    out = out + b_ref[1:2, :d_out_p]
    o_ref[...] = out.astype(o_ref.dtype)


def pack_actor_params(w1, b1, w2, b2):
    """One-time parameter packing for the kernel.

    - Pads fc2 weight/bias along the output dim up to a multiple of 128 so the
      kernel's output stores are lane-dense (unmasked).
    - Packs both biases into a single [2, L] operand to cut the DMA count.
    Returns (w1, b_packed, w2_padded, d_out).
    """
    H = w1.shape[1]
    d_out = w2.shape[1]
    d_out_p = _round_up(d_out, 128)

    if d_out_p != d_out:
        w2 = jnp.pad(w2, ((0, 0), (0, d_out_p - d_out)))
        b2 = jnp.pad(b2, (0, d_out_p - d_out))

    L = max(H, d_out_p)
    b_packed = jnp.zeros((2, L), w1.dtype)
    b_packed = b_packed.at[0, :H].set(b1)
    b_packed = b_packed.at[1, :d_out_p].set(b2)
    return w1, b_packed, w2, d_out


def actor_forward(state, packed_params, *, block_b=512, mxu_dtype=jnp.float32):
    """Fused forward pass: tanh(state @ W1 + b1) @ W2 + b2.

    state:         [B, D_in] float32
    packed_params: output of pack_actor_params
    block_b:       batch tile when B is large (weights stay VMEM-resident)
    mxu_dtype:     jnp.float32 (default) or jnp.bfloat16 (v6e/v7x large batch)
    """
    w1, b_packed, w2_p, d_out = packed_params
    B, d_in = state.shape
    H = w1.shape[1]
    d_out_p = w2_p.shape[1]

    kernel = functools.partial(_actor_kernel, mxu_dtype=mxu_dtype)

    if B <= block_b:
        # Single-block case: no grid, no pipeline machinery. Whole operands in VMEM.
        vmem = pl.BlockSpec(memory_space=pltpu.MemorySpace.VMEM)
        out_p = pl.pallas_call(
            kernel,
            out_shape=jax.ShapeDtypeStruct((B, d_out_p), state.dtype),
            in_specs=[vmem, vmem, vmem, vmem],
            out_specs=vmem,
        )(state, w1, b_packed, w2_p)
    else:
        # Large batch: tile only the batch axis; weights/biases are resident
        # across the whole grid. Batch axis is "parallel" (v7x megacore sharding).
        TB = block_b
        out_p = pl.pallas_call(
            kernel,
            out_shape=jax.ShapeDtypeStruct((B, d_out_p), state.dtype),
            grid=(pl.cdiv(B, TB),),
            in_specs=[
                pl.BlockSpec((TB, d_in), lambda i: (i, 0)),
                pl.BlockSpec((d_in, H), lambda i: (0, 0)),
                pl.BlockSpec(b_packed.shape, lambda i: (0, 0)),
                pl.BlockSpec((H, d_out_p), lambda i: (0, 0)),
            ],
            out_specs=pl.BlockSpec((TB, d_out_p), lambda i: (i, 0)),
            compiler_params=pltpu.CompilerParams(
                dimension_semantics=("parallel",)),
        )(state, w1, b_packed, w2_p)

    # Drop the lane-padding columns (no-op slice if d_out is already 128-aligned).
    return out_p[:, :d_out]


def init_actor_params(key, input_size, output_size, hidden=128):
    """Deterministic init mimicking nn.Linear default (uniform +/- 1/sqrt(fan_in)).

    Weights are stored transposed vs. PyTorch: W1 [D_in, H], W2 [H, D_out].
    """
    k1, k2, k3, k4 = jax.random.split(key, 4)
    bound1 = 1.0 / math.sqrt(input_size)
    bound2 = 1.0 / math.sqrt(hidden)
    w1 = jax.random.uniform(k1, (input_size, hidden), jnp.float32, -bound1, bound1)
    b1 = jax.random.uniform(k2, (hidden,), jnp.float32, -bound1, bound1)
    w2 = jax.random.uniform(k3, (hidden, output_size), jnp.float32, -bound2, bound2)
    b2 = jax.random.uniform(k4, (output_size,), jnp.float32, -bound2, bound2)
    return w1, b1, w2, b2


if __name__ == "__main__":
    key = jax.random.PRNGKey(0)
    k_x, k_p, k_x2 = jax.random.split(key, 3)

    batch = 8
    input_size = 32
    output_size = 8

    state = jax.random.normal(k_x, (batch, input_size), jnp.float32)
    w1, b1, w2, b2 = init_actor_params(k_p, input_size, output_size)
    packed = pack_actor_params(w1, b1, w2, b2)

    # Small-batch path (no grid, single VMEM block).
    out = jax.block_until_ready(actor_forward(state, packed))
    ref = jnp.tanh(state @ w1 + b1) @ w2 + b2
    assert out.shape == (batch, output_size)
    assert jnp.allclose(out, ref, atol=1e-5, rtol=1e-5)

    # Batch-tiled path (resident weights, "parallel" batch axis).
    big_state = jax.random.normal(k_x2, (1024, input_size), jnp.float32)
    out_big = jax.block_until_ready(actor_forward(big_state, packed, block_b=256))
    ref_big = jnp.tanh(big_state @ w1 + b1) @ w2 + b2
    assert out_big.shape == (1024, output_size)
    assert jnp.allclose(out_big, ref_big, atol=1e-5, rtol=1e-5)

    print("KERNEL_OK")
</pallas_src>

<mosaic_0001>
module attributes {stable_mosaic.version = 11 : i64} {
  func.func @_actor_kernel(%arg0: memref<8x32xf32, #tpu.memory_space<vmem>>, %arg1: memref<32x128xf32, #tpu.memory_space<vmem>>, %arg2: memref<2x128xf32, #tpu.memory_space<vmem>>, %arg3: memref<128x128xf32, #tpu.memory_space<vmem>>, %arg4: memref<8x128xf32, #tpu.memory_space<vmem>>) attributes {dimension_semantics = [], scalar_prefetch = 0 : i64, scratch_operands = 0 : i64, tpu.core_type = #tpu.core_type<tc>} {
    %c0 = arith.constant 0 : index
    %c0_0 = arith.constant 0 : index
    %0 = vector.load %arg0[%c0, %c0_0] : memref<8x32xf32, #tpu.memory_space<vmem>>, vector<8x32xf32>
    %c0_1 = arith.constant 0 : index
    %c0_2 = arith.constant 0 : index
    %1 = vector.load %arg1[%c0_1, %c0_2] : memref<32x128xf32, #tpu.memory_space<vmem>>, vector<32x128xf32>
    %cst = arith.constant dense<0.000000e+00> : vector<8x128xf32>
    %2 = tpu.matmul %0, %1, %cst {dimension_numbers = #tpu.dot_dimension_numbers<[1], [0], [0], [1], [0, 0, 1, 1], [], []>} : vector<8x32xf32>, vector<32x128xf32>, vector<8x128xf32> -> vector<8x128xf32>
    %c0_3 = arith.constant 0 : index
    %c0_4 = arith.constant 0 : index
    %3 = vector.load %arg2[%c0_3, %c0_4] : memref<2x128xf32, #tpu.memory_space<vmem>>, vector<1x128xf32>
    %4 = vector.broadcast %3 : vector<1x128xf32> to vector<8x128xf32>
    %5 = arith.addf %2, %4 : vector<8x128xf32>
    %6 = math.tanh %5 : vector<8x128xf32>
    %c0_5 = arith.constant 0 : index
    %c0_6 = arith.constant 0 : index
    %7 = vector.load %arg3[%c0_5, %c0_6] : memref<128x128xf32, #tpu.memory_space<vmem>>, vector<128x128xf32>
    %cst_7 = arith.constant dense<0.000000e+00> : vector<8x128xf32>
    %8 = tpu.matmul %6, %7, %cst_7 {dimension_numbers = #tpu.dot_dimension_numbers<[1], [0], [0], [1], [0, 0, 1, 1], [], []>} : vector<8x128xf32>, vector<128x128xf32>, vector<8x128xf32> -> vector<8x128xf32>
    %c1 = arith.constant 1 : index
    %c0_8 = arith.constant 0 : index
    %9 = vector.load %arg2[%c1, %c0_8] : memref<2x128xf32, #tpu.memory_space<vmem>>, vector<1x128xf32>
    %10 = vector.broadcast %9 : vector<1x128xf32> to vector<8x128xf32>
    %11 = arith.addf %8, %10 : vector<8x128xf32>
    %c0_9 = arith.constant 0 : index
    %c0_10 = arith.constant 0 : index
    %12 = vector.load %arg4[%c0_9, %c0_10] : memref<8x128xf32, #tpu.memory_space<vmem>>, vector<8x128xf32>
    tpu.vector_store %arg4[%c0_9, %c0_10], %11 {strides = array<i32>} : memref<8x128xf32, #tpu.memory_space<vmem>>, vector<8x128xf32>,
    return
  }
}

</mosaic_0001>

<bundles_post_ra>
// kernel: tpu_custom_call.1
= control target key start
LH: loop header
LB: loop body
LE: loop exit
PB: predicated region body
PF: predicated region fallthrough
CT: control target
= control target key end

     0   :  { %9 = vsyncpa [#allocation3], 0  ;;  %s550_s0 = inlined_call_operand.hbm [shape: f32[8,32], index: 0, kind: input, shape index: {}]   ;;  %s551_s1 = inlined_call_operand.hbm [shape: f32[32,128], index: 1, kind: input, shape index: {}]   ;;  %s552_s2 = inlined_call_operand.vmem [shape: f32[2,128], index: 2, kind: input, shape index: {}]   ;;  %s553_s3 = inlined_call_operand.hbm [shape: f32[128,128], index: 3, kind: input, shape index: {}]   ;;  %s554_s4 = inlined_call_operand.hbm [shape: f32[8,128], index: 4, kind: output, shape index: {}]  }
   0x1   :  { %10 = vsyncpa [#allocation6], 0 }
   0x2   :  { %11 = vsyncpa [#allocation4], 0  ;;  %s456_s15 = smov [#allocation5]   ;;  %s362_s19 = scalar_lea.hbm %s551_s1, 512 }
   0x3   :  { %s27_s16 = sshll.u32 %s456_s15, 4  ;;  %p363_p0 = scmp.ne.s32.totalorder %s551_s1, %s362_s19  ;;  %s28_s16 = int_to_ptr.vmem [resolvable:$true] %s27_s16 }
   0x4   :  { %p366_p1 = scmp.lt.u32.totalorder %s362_s19, %s551_s1 }
   0x6   :  { %p368_p2 = pnand %p366_p1, %p363_p0 }
   0x8   :  { %371 = shalt.err (!%p368_p2)
}
   0x9   :  { %s372_s24 = scalar_lea.vmem %s28_s16, 512  ;;  %p377_p4 = scmp.lt.s32.totalorder %s28_s16, %s28_s16 }
   0xa   :  { %p373_p3 = scmp.ne.s32.totalorder %s28_s16, %s372_s24  ;;  %p378_p5 = scmp.lt.s32.totalorder %s372_s24, %s372_s24 }
   0xc   :  { %p379_p6 = por %p378_p5, %p377_p4 }
   0xe   :  { %p380_p7 = pnand %p379_p6, %p373_p3 }
  0x10   :  { %383 = shalt.err (!%p380_p7)
}
  0x11   :  { %s457_s25 = smov 128   ;;  %s458_s26 = smov 8  }
  0x12   :  { %33 = dma.hbm_to_vmem [thread:$0]  %s551_s1, 512, %s28_s16, [#allocation6], %s457_s25, %s457_s25, %s458_s26  }
  0x13   :  { %s459_s29 = smov [#allocation2]   ;;  %s460_s5 = smov [#allocation7]  }
  0x14   :  { %s18_s30 = sshll.u32 %s459_s29, 4  ;;  %s41_s6 = sshll.u32 %s460_s5, 4  ;;  %s19_s30 = int_to_ptr.vmem [resolvable:$true] %s18_s30  ;;  %s42_s6 = int_to_ptr.vmem [resolvable:$true] %s41_s6 }
  0x15   :  { %s384_s9 = scalar_lea.hbm %s550_s0, 128 }
  0x16   :  { %p385_p8 = scmp.ne.s32.totalorder %s550_s0, %s384_s9  ;;  %p388_p9 = scmp.lt.u32.totalorder %s384_s9, %s550_s0 }
  0x18   :  { %p390_p10 = pnand %p388_p9, %p385_p8 }
  0x1a   :  { %393 = shalt.err (!%p390_p10)
}
  0x1b   :  { %s394_s1 = scalar_lea.vmem %s19_s30, 128  ;;  %p399_p12 = scmp.lt.s32.totalorder %s19_s30, %s19_s30 }
  0x1c   :  { %p395_p11 = scmp.ne.s32.totalorder %s19_s30, %s394_s1  ;;  %p400_p13 = scmp.lt.s32.totalorder %s394_s1, %s394_s1 }
  0x1e   :  { %p401_p0 = por %p400_p13, %p399_p12 }
  0x20   :  { %p402_p1 = pnand %p401_p0, %p395_p11 }
  0x22   :  { %405 = shalt.err (!%p402_p1)
}
  0x23   :  { %21 = dma.hbm_to_vmem [thread:$0]  %s550_s0, 128, %s19_s30, [#allocation3]  }
  0x24   :  { %s406_s18 = scalar_lea.hbm %s553_s3, 2048 }
  0x25   :  { %p407_p2 = scmp.ne.s32.totalorder %s553_s3, %s406_s18  ;;  %p410_p3 = scmp.lt.u32.totalorder %s406_s18, %s553_s3 }
  0x27   :  { %p412_p4 = pnand %p410_p3, %p407_p2 }
  0x29   :  { %415 = shalt.err (!%p412_p4)
}
  0x2a   :  { %s416_s23 = scalar_lea.vmem %s42_s6, 2048  ;;  %p421_p6 = scmp.lt.s32.totalorder %s42_s6, %s42_s6 }
  0x2b   :  { %p417_p5 = scmp.ne.s32.totalorder %s42_s6, %s416_s23  ;;  %p422_p7 = scmp.lt.s32.totalorder %s416_s23, %s416_s23 }
  0x2d   :  { %p423_p8 = por %p422_p7, %p421_p6 }
  0x2f   :  { %p424_p9 = pnand %p423_p8, %p417_p5 }
  0x31   :  { %427 = shalt.err (!%p424_p9)
}
  0x32   :  { %47 = dma.hbm_to_vmem [thread:$0]  %s553_s3, 2048, %s42_s6, [#allocation6], %s457_s25, %s457_s25, %s458_s26  }
  0x33   :  { %450 = dma.done.wait [#allocation3], 128  }
  0x34   :  { %451 = vsyncadd [#allocation3], 4294967168 }
  0x35   :  { %452 = dma.done.wait [#allocation6], 2560  }
  0x36   :  { %453 = vsyncadd [#allocation6], 4294964736  ;;  %v461_v0 = vmov 0.0|0.0   ;;  %vm462_vm0 = vmmov 0   ;;  %v463_v1 = vmov 0.0   ;;  %v58_v2 = vld [vmem:[#allocation5] sm:$0xff] }
  0x37   :  { %321 = vmatprep.subr.bf16.mxu0 %v461_v0  ;;  %283 = vmatprep.mubr.msk.f32.mxu0 %vm462_vm0, %v463_v1  ;;  %v59_v3 = vld [vmem:[#allocation5 + $0x8] sm:$0xff]  ;;  %v60_v4 = vld [vmem:[#allocation5 + $0x10] sm:$0xff]  ;;  %v61_v6 = vld [vmem:[#allocation5 + $0x18] sm:$0xff]  ;;  %vm67_vm1 = vcmask 261120   ;;  %s464_s28 = smov [#allocation8]  }
  0x38   :  { %327 = vmatprep.subr.bf16.mxu1 %v461_v0  ;;  %318 = vmatprep.mubr.msk.f32.mxu1 %vm462_vm0, %v463_v1  ;;  %v322_v5 = vpack.c.bf16 %v59_v3, %v58_v2  ;;  %v142_v7 = vld [vmem:[#allocation7] sm:$0xff]  ;;  %v143_v8 = vld [vmem:[#allocation7 + $0x8] sm:$0xff]  ;;  %v144_v9 = vld [vmem:[#allocation7 + $0x10] sm:$0xff]  ;;  %v325_v11 = vpack.c.bf16 %v61_v6, %v60_v4  ;;  %s240_s29 = sshll.u32 %s464_s28, 4  ;;  %s241_s29 = int_to_ptr.vmem [resolvable:$true] %s240_s29 }
  0x39   :  { %v145_v10 = vld [vmem:[#allocation7 + $0x18] sm:$0xff]  ;;  %v328_v12 = vpack.c.bf16 %v143_v8, %v142_v7  ;;  %v146_v14 = vld [vmem:[#allocation7 + $0x20] sm:$0xff]  ;;  %v147_v15 = vld [vmem:[#allocation7 + $0x28] sm:$0xff]  ;;  %s428_s30 = scalar_lea.vmem %s241_s29, 128  ;;  %p433_p11 = scmp.lt.s32.totalorder %s241_s29, %s241_s29 }
  0x3a   :  { %323 = vmatpush3.bf16.msra.mxu0 %v322_v5  ;;  %v331_v13 = vpack.c.bf16 %v145_v10, %v144_v9  ;;  %v57_v16 = vld [vmem:[#allocation2] sm:$0xff]  ;;  %v334_v17 = vpack.c.bf16 %v147_v15, %v146_v14  ;;  %v148_v18 = vld [vmem:[#allocation7 + $0x30] sm:$0xff]  ;;  %v150_v21 = vld [vmem:[#allocation7 + $0x40] sm:$0xff]  ;;  %p429_p10 = scmp.ne.s32.totalorder %s241_s29, %s428_s30  ;;  %p434_p12 = scmp.lt.s32.totalorder %s428_s30, %s428_s30 }
  0x3b   :  { %324 = vmatprep.subr.bf16.mxu0 %v461_v0  ;;  %329 = vmatpush3.bf16.msra.mxu1 %v328_v12  ;;  %v149_v19 = vld [vmem:[#allocation7 + $0x38] sm:$0xff]  ;;  %v151_v22 = vld [vmem:[#allocation7 + $0x48] sm:$0xff]  ;;  %v152_v24 = vld [vmem:[#allocation7 + $0x50] sm:$0xff] }
  0x3c   :  { %330 = vmatprep.subr.bf16.mxu1 %v461_v0  ;;  %v337_v20 = vpack.c.bf16 %v149_v19, %v148_v18  ;;  %v340_v23 = vpack.c.bf16 %v151_v22, %v150_v21  ;;  %v153_v25 = vld [vmem:[#allocation7 + $0x58] sm:$0xff]  ;;  %v154_v27 = vld [vmem:[#allocation7 + $0x60] sm:$0xff]  ;;  %v155_v28 = vld [vmem:[#allocation7 + $0x68] sm:$0xff]  ;;  %p435_p13 = por %p434_p12, %p433_p11 }
  0x3d   :  { %v343_v26 = vpack.c.bf16 %v153_v25, %v152_v24  ;;  %v346_v29 = vpack.c.bf16 %v155_v28, %v154_v27  ;;  %v156_v30 = vld [vmem:[#allocation7 + $0x70] sm:$0xff]  ;;  %v157_v31 = vld [vmem:[#allocation7 + $0x78] sm:$0xff] }
  0x3e   :  { %326 = vmatpush3.bf16.msra.mxu0 %v325_v11  ;;  %v349_v32 = vpack.c.bf16 %v157_v31, %v156_v30  ;;  %v250_v33 = vld [vmem:[%s552_s2] ss:$0 sm:$0xff]  ;;  %v252_v38 = vld [vmem:[%s552_s2 + $0x1] ss:$0 sm:$0xff]  ;;  %p436_p0 = pnand %p435_p13, %p429_p10 }
  0x3f   :  { %332 = vmatpush3.bf16.msra.mxu1 %v331_v13 }
  0x40   :  { %333 = vmatprep.subr.bf16.mxu1 %v461_v0 }
  0x41   :  { %284 = vmatmul.mubr.msk.f32.vlgmr.msra.gmra.mrb[0].mxu0 %vm67_vm1, %v57_v16 }
  0x43   :  { %335 = vmatpush3.bf16.msra.mxu1 %v334_v17 }
  0x44   :  { %336 = vmatprep.subr.bf16.mxu1 %v461_v0 }
  0x47   :  { %338 = vmatpush3.bf16.msra.mxu1 %v337_v20 }
  0x48   :  { %339 = vmatprep.subr.bf16.mxu1 %v461_v0 }
  0x4b   :  { %341 = vmatpush3.bf16.msra.mxu1 %v340_v23 }
  0x4c   :  { %342 = vmatprep.subr.bf16.mxu1 %v461_v0 }
  0x4f   :  { %344 = vmatpush3.bf16.msra.mxu1 %v343_v26 }
  0x50   :  { %345 = vmatprep.subr.bf16.mxu1 %v461_v0 }
  0x53   :  { %347 = vmatpush3.bf16.msra.mxu1 %v346_v29 }
  0x54   :  { %348 = vmatprep.subr.bf16.mxu1 %v461_v0 }
  0x57   :  { %350 = vmatpush3.bf16.msra.mxu1 %v349_v32 }
 0x114   :  { %v137_v34 = vpop.f32.mrb[0].mxu0 }
 0x115   :  { %v138_v35 = vadd.f32 %v250_v33, %v137_v34  ;;  %v285_v36 = vpop.f32.mrb[1].mxu0 }
 0x117   :  { %360 = vtanh.f32 %v138_v35 }
 0x121   :  { %v361_v37 = vpop.eup %360 }
 0x122   :  { %319 = vmatmul.mubr.f32.vlgmr.msra.gmra.mrb[0].mxu1 %v361_v37 }
 0x1f5   :  { %v229_v39 = vpop.f32.mrb[0].mxu1 }
 0x1f6   :  { %v230_v40 = vadd.f32 %v252_v38, %v229_v39  ;;  %v320_v41 = vpop.f32.mrb[1].mxu1 }
 0x1f8   :  { %233 = vst [vmem:[#allocation8] sm:$0xff] %v230_v40 }
 0x1f9   :  { %439 = shalt.err (!%p436_p0)
}
 0x1fa   :  { %s440_s7 = scalar_lea.hbm %s554_s4, 128 }
 0x1fb   :  { %p441_p1 = scmp.ne.s32.totalorder %s554_s4, %s440_s7  ;;  %p444_p2 = scmp.lt.u32.totalorder %s440_s7, %s554_s4 }
 0x1fd   :  { %p446_p3 = pnand %p444_p2, %p441_p1 }
 0x1ff   :  { %449 = shalt.err (!%p446_p3)
}
 0x200   :  { %243 = dma.vmem_to_hbm [thread:$0]  %s241_s29, 128, %s554_s4, [#allocation4]  }
 0x201   :  { %454 = dma.done.wait [#allocation4], 128  }
 0x202   :  { %455 = vsyncadd [#allocation4], 4294967168 }
 0x203   :  { %247 = vsyncpa [#allocation3], 1 }
 0x204   :  { %248 = vsyncpa [#allocation6], 1 }
 0x205   :  { %249 = vsyncpa [#allocation4], 1 }

</bundles_post_ra>
